<compile_context>
chip_gen: v6e
topology: v6e:2x2x1
jax: 0.10.0
libtpu: 0.0.40
codegen_flags: <defaults>
</compile_context>

<pallas_src>
import jax
import jax.numpy as jnp
from jax.experimental import pallas as pl
from jax.experimental.pallas import tpu as pltpu

_LANE = 128
_MAX_ROWS_4D = 4096            # rows per block on the (rows,128) path -> 6 MiB f32 buffer
_MAX_PIX_3D = 1024 * _LANE     # flat pixels per block on the ragged path
_TARGET_BLOCK_BYTES = 6 << 20  # pack small images up to ~6 MiB per block
_SPLIT_MIN_BYTES = 1 << 20     # split a single-block image >= 1 MiB across 2 grid points
_VMEM_LIMIT_BYTES = 40 << 20   # explicit scoped-VMEM limit (v5e default 16 MiB is too small)


def _saturation_kernel(scal_ref, x_ref, o_ref):
    # scal_ref: SMEM float32[1] = [factor]
    # x_ref/o_ref: (Nb, 3, S, 128) or (Nb, 3, BLK) float tile
    f = scal_ref[0]
    one_minus_f = 1.0 - f          # hoisted scalar math
    x = x_ref[...]
    # torchvision rgb_to_grayscale coefficients
    gray = 0.2989 * x[:, 0:1] + 0.587 * x[:, 1:2] + 0.114 * x[:, 2:3]
    o_ref[...] = jnp.clip(f * x + one_minus_f * gray, 0.0, 1.0).astype(o_ref.dtype)


def _largest_divisor_leq(n, k):
    k = max(1, min(n, int(k)))
    while n % k:
        k -= 1
    return k


def saturation_pallas(img, factor, *, block_rows=None, block_pixels=None):
    """img: (N, 3, H, W) float (values in [0, 1]); factor: scalar saturation factor.

    block_rows / block_pixels are test-only overrides for the block sizes.
    """
    N, C, H, W = img.shape
    assert C == 3, "adjust_saturation requires 3 (RGB) channels"
    P = H * W
    itemsize = jnp.dtype(img.dtype).itemsize
    scal = jnp.asarray(factor, dtype=jnp.float32).reshape(1)

    lane_dense = (P % _LANE == 0)
    if lane_dense:
        # Free reshape to the lane-dense view: full (8,128) vreg/VMEM utilization.
        rows = P // _LANE
        x = img.reshape(N, C, rows, _LANE)
        max_rows = _MAX_ROWS_4D if block_rows is None else block_rows
        if rows <= max_rows:
            s = rows                      # full-extent sublane dim (legal even if not %8)
        else:
            s = max_rows
            assert s % 8 == 0
        grid_p = pl.cdiv(rows, s)         # partial last block is masked on store
        pix_block_bytes = C * s * _LANE * itemsize
    else:
        # Ragged pixel count: flat (N, 3, P) view, block lane dim multiple of 128.
        # No host-side pad/slice; the partial tail block is masked on store.
        x = img.reshape(N, C, P)
        max_pix = _MAX_PIX_3D if block_pixels is None else block_pixels
        if P <= max_pix:
            blk = P                       # full-extent lane dim
        else:
            blk = max_pix
            assert blk % _LANE == 0
        grid_p = pl.cdiv(P, blk)
        pix_block_bytes = C * blk * itemsize

    # Small-image packing: several images per block so each grid step is DMA-bound,
    # not dominated by the ~0.35 us per-step overhead.
    if grid_p == 1:
        nb = _largest_divisor_leq(N, _TARGET_BLOCK_BYTES // max(pix_block_bytes, 1))
    else:
        nb = 1
    grid_n = N // nb

    # Make sure a single medium/large image still yields >=2 grid points so both
    # v7x TensorCores (and their HBM bandwidth shares) are used.
    if grid_n * grid_p == 1 and nb * pix_block_bytes >= _SPLIT_MIN_BYTES:
        if nb >= 2:
            nb = _largest_divisor_leq(N, nb // 2)
            grid_n = N // nb
        if grid_n * grid_p == 1:
            if lane_dense and rows > 8:
                s2 = 8 * pl.cdiv(pl.cdiv(rows, 2), 8)
                if s2 < rows:
                    s = s2
                    grid_p = pl.cdiv(rows, s)
            elif (not lane_dense) and P > _LANE:
                blk2 = _LANE * pl.cdiv(pl.cdiv(P, 2), _LANE)
                if blk2 < P:
                    blk = blk2
                    grid_p = pl.cdiv(P, blk)

    if lane_dense:
        block = (nb, C, s, _LANE)
        index_map = lambda n, j, scal_ref: (n, 0, j, 0)
    else:
        block = (nb, C, blk)
        index_map = lambda n, j, scal_ref: (n, 0, j)

    out = pl.pallas_call(
        _saturation_kernel,
        out_shape=jax.ShapeDtypeStruct(x.shape, img.dtype),
        grid_spec=pltpu.PrefetchScalarGridSpec(
            num_scalar_prefetch=1,
            grid=(grid_n, grid_p),
            in_specs=[pl.BlockSpec(block, index_map)],
            out_specs=pl.BlockSpec(block, index_map),
        ),
        compiler_params=pltpu.CompilerParams(
            dimension_semantics=("parallel", "parallel"),
            vmem_limit_bytes=_VMEM_LIMIT_BYTES,
        ),
    )(scal, x)
    return out.reshape(N, C, H, W)  # free reshape of the contiguous result


def saturation_forward(img, key, bounds=(0.9, 0.9), p=0.5):
    """Mirrors Saturation.forward: sample factor, apply with probability p."""
    k_factor, k_apply = jax.random.split(key)
    factor = jax.random.uniform(
        k_factor, (), minval=bounds[0], maxval=bounds[1], dtype=jnp.float32
    )
    apply_flag = jax.random.uniform(k_apply, (), dtype=jnp.float32) < p
    # Skip the kernel (and its full HBM round trip) entirely on the "no apply"
    # branch.  NOTE: under vmap, cond lowers to select — there, fold the flag
    # into the factor (factor=1.0) instead.
    return jax.lax.cond(
        apply_flag,
        lambda im: saturation_pallas(im, factor),
        lambda im: im,
        img,
    )
    # TODO(synk): the PyTorch module also passes through an optional `label`; it is
    # untouched by the op and omitted here.


def _reference(img, factor):
    r, g, b = img[:, 0:1], img[:, 1:2], img[:, 2:3]
    gray = 0.2989 * r + 0.587 * g + 0.114 * b
    return jnp.clip(factor * img + (1.0 - factor) * gray, 0.0, 1.0)


if __name__ == "__main__":
    key = jax.random.PRNGKey(0)
    k1, k2, k3, kf = jax.random.split(key, 4)

    # Case 1: small RGB batch, H*W % 128 == 0 -> lane-dense 4-D path, images packed
    # into a single block.
    img = jax.random.uniform(k1, (2, 3, 16, 16), dtype=jnp.float32)
    out = jax.block_until_ready(saturation_pallas(img, 0.9))
    ref = _reference(img, jnp.float32(0.9))
    assert out.shape == img.shape and out.dtype == img.dtype
    assert float(jnp.max(jnp.abs(out - ref))) < 1e-6

    # Case 2: ragged pixel count (20*20=400, not %128) -> flat 3-D path, full-extent block.
    img2 = jax.random.uniform(k2, (1, 3, 20, 20), dtype=jnp.float32)
    out2 = jax.block_until_ready(saturation_pallas(img2, 0.9))
    ref2 = _reference(img2, jnp.float32(0.9))
    assert out2.shape == img2.shape
    assert float(jnp.max(jnp.abs(out2 - ref2))) < 1e-6

    # Case 3: force the multi-block / masked-partial-tile paths on small data.
    img3 = jax.random.uniform(k3, (1, 3, 48, 64), dtype=jnp.float32)   # rows=24
    out3 = jax.block_until_ready(saturation_pallas(img3, 0.9, block_rows=16))
    ref3 = _reference(img3, jnp.float32(0.9))
    assert float(jnp.max(jnp.abs(out3 - ref3))) < 1e-6

    out4 = jax.block_until_ready(saturation_pallas(img2, 0.9, block_pixels=256))
    assert float(jnp.max(jnp.abs(out4 - ref2))) < 1e-6

    # Full forward semantics (random factor + Bernoulli skip via lax.cond).
    outf = jax.block_until_ready(saturation_forward(img, kf, bounds=(0.9, 0.9), p=0.5))
    kfa, kap = jax.random.split(kf)
    factor = jax.random.uniform(kfa, (), minval=0.9, maxval=0.9, dtype=jnp.float32)
    applied = jax.random.uniform(kap, (), dtype=jnp.float32) < 0.5
    reff = jnp.where(applied, _reference(img, factor), img)
    assert float(jnp.max(jnp.abs(outf - reff))) < 1e-6

    print("KERNEL_OK")
</pallas_src>

<mosaic_0001>
module attributes {stable_mosaic.version = 11 : i64} {
  func.func @_saturation_kernel(%arg0: i32, %arg1: i32, %arg2: memref<1xf32, #tpu.memory_space<smem>>, %arg3: memref<2x3x2x128xf32, #tpu.memory_space<vmem>>, %arg4: memref<2x3x2x128xf32, #tpu.memory_space<vmem>>) attributes {dimension_semantics = [#tpu.dimension_semantics<parallel>, #tpu.dimension_semantics<parallel>], iteration_bounds = array<i64: 1, 1>, scalar_prefetch = 1 : i64, scratch_operands = 0 : i64, tpu.core_type = #tpu.core_type<tc>, window_params = [{transform_indices = @transform_0, window_bounds = array<i64: 2, 3, 2, 128>}, {transform_indices = @transform_1, window_bounds = array<i64: 2, 3, 2, 128>}]} {
    %c0 = arith.constant 0 : index
    %0 = memref.load %arg2[%c0] : memref<1xf32, #tpu.memory_space<smem>>
    %cst = arith.constant 1.000000e+00 : f32
    %1 = arith.subf %cst, %0 : f32
    %c0_0 = arith.constant 0 : index
    %c0_1 = arith.constant 0 : index
    %c0_2 = arith.constant 0 : index
    %c0_3 = arith.constant 0 : index
    %2 = vector.load %arg3[%c0_0, %c0_1, %c0_2, %c0_3] : memref<2x3x2x128xf32, #tpu.memory_space<vmem>>, vector<2x3x2x128xf32>
    %3 = vector.extract_strided_slice %2 {offsets = [0, 0, 0, 0], sizes = [2, 1, 2, 128], strides = [1, 1, 1, 1]} : vector<2x3x2x128xf32> to vector<2x1x2x128xf32>
    %cst_4 = arith.constant 2.989000e-01 : f32
    %4 = vector.broadcast %cst_4 : f32 to vector<2x1x2x128xf32>
    %5 = arith.mulf %4, %3 : vector<2x1x2x128xf32>
    %6 = vector.extract_strided_slice %2 {offsets = [0, 1, 0, 0], sizes = [2, 1, 2, 128], strides = [1, 1, 1, 1]} : vector<2x3x2x128xf32> to vector<2x1x2x128xf32>
    %cst_5 = arith.constant 5.870000e-01 : f32
    %7 = vector.broadcast %cst_5 : f32 to vector<2x1x2x128xf32>
    %8 = arith.mulf %7, %6 : vector<2x1x2x128xf32>
    %9 = arith.addf %5, %8 : vector<2x1x2x128xf32>
    %10 = vector.extract_strided_slice %2 {offsets = [0, 2, 0, 0], sizes = [2, 1, 2, 128], strides = [1, 1, 1, 1]} : vector<2x3x2x128xf32> to vector<2x1x2x128xf32>
    %cst_6 = arith.constant 1.140000e-01 : f32
    %11 = vector.broadcast %cst_6 : f32 to vector<2x1x2x128xf32>
    %12 = arith.mulf %11, %10 : vector<2x1x2x128xf32>
    %13 = arith.addf %9, %12 : vector<2x1x2x128xf32>
    %14 = vector.broadcast %0 : f32 to vector<2x3x2x128xf32>
    %15 = arith.mulf %14, %2 : vector<2x3x2x128xf32>
    %16 = vector.broadcast %1 : f32 to vector<2x1x2x128xf32>
    %17 = arith.mulf %16, %13 : vector<2x1x2x128xf32>
    %18 = vector.broadcast %17 : vector<2x1x2x128xf32> to vector<2x3x2x128xf32>
    %19 = arith.addf %15, %18 : vector<2x3x2x128xf32>
    %cst_7 = arith.constant 0.000000e+00 : f32
    %cst_8 = arith.constant 1.000000e+00 : f32
    %20 = vector.broadcast %cst_7 : f32 to vector<2x3x2x128xf32>
    %21 = arith.maximumf %20, %19 : vector<2x3x2x128xf32>
    %22 = vector.broadcast %cst_8 : f32 to vector<2x3x2x128xf32>
    %23 = arith.minimumf %22, %21 : vector<2x3x2x128xf32>
    %c0_9 = arith.constant 0 : index
    %c0_10 = arith.constant 0 : index
    %c0_11 = arith.constant 0 : index
    %c0_12 = arith.constant 0 : index
    %24 = vector.load %arg4[%c0_9, %c0_10, %c0_11, %c0_12] : memref<2x3x2x128xf32, #tpu.memory_space<vmem>>, vector<2x3x2x128xf32>
    tpu.vector_store %arg4[%c0_9, %c0_10, %c0_11, %c0_12], %23 {strides = array<i32>} : memref<2x3x2x128xf32, #tpu.memory_space<vmem>>, vector<2x3x2x128xf32>,
    return
  }
  func.func @transform_0(%arg0: i32, %arg1: i32, %arg2: memref<1xf32, #tpu.memory_space<smem>>) -> (i32, i32, i32, i32) {
    %c0_i32 = arith.constant 0 : i32
    %c0_i32_0 = arith.constant 0 : i32
    %c0_i32_1 = arith.constant 0 : i32
    return %arg0, %c0_i32, %arg1, %c0_i32_0 : i32, i32, i32, i32
  }
  func.func @transform_1(%arg0: i32, %arg1: i32, %arg2: memref<1xf32, #tpu.memory_space<smem>>) -> (i32, i32, i32, i32) {
    %c0_i32 = arith.constant 0 : i32
    %c0_i32_0 = arith.constant 0 : i32
    %c0_i32_1 = arith.constant 0 : i32
    return %arg0, %c0_i32, %arg1, %c0_i32_0 : i32, i32, i32, i32
  }
}

</mosaic_0001>

<bundles_post_ra>
// kernel: tpu_custom_call.1
= control target key start
LH: loop header
LB: loop body
LE: loop exit
PB: predicated region body
PF: predicated region fallthrough
CT: control target
= control target key end

     0   :  { %8 = vsyncpa [#allocation5], 0  ;;  %s179_s0 = inlined_call_operand.<no memory space> [shape: f32[1], index: 0, kind: input, shape index: {}]   ;;  %s180_s1 = inlined_call_operand.hbm [shape: f32[2,3,2,128], index: 1, kind: input, shape index: {}]   ;;  %s181_s2 = inlined_call_operand.hbm [shape: f32[2,3,2,128], index: 2, kind: output, shape index: {}]  }
   0x1   :  { %9 = vsyncpa [#allocation6], 0  ;;  %s142_s9 = smov [#allocation4]  }
   0x2   :  { %s15_s10 = sshll.u32 %s142_s9, 4  ;;  %s16_s10 = int_to_ptr.vmem [resolvable:$true] %s15_s10 }
   0x3   :  { %s106_s11 = scalar_lea.vmem %s16_s10, 192  ;;  %p111_p1 = scmp.lt.s32.totalorder %s16_s10, %s16_s10 }
   0x4   :  { %p107_p0 = scmp.ne.s32.totalorder %s16_s10, %s106_s11  ;;  %p112_p2 = scmp.lt.s32.totalorder %s106_s11, %s106_s11 }
   0x6   :  { %p113_p3 = por %p112_p2, %p111_p1 }
   0x8   :  { %p114_p4 = pnand %p113_p3, %p107_p0 }
   0xa   :  { %117 = shalt.err (!%p114_p4)
}
   0xb   :  { %s143_s12 = smov 32   ;;  %s144_s13 = smov 2  }
   0xc   :  { %21 = dma.hbm_to_vmem [thread:$0]  %s180_s1, 192, %s16_s10, [#allocation5], %s143_s12, %s143_s12, %s144_s13  }
   0xd   :  { %138 = dma.done.wait [#allocation5], 192  }
   0xe   :  { %139 = vsyncadd [#allocation5], 4294967104  ;;  %s26_s18 = ssub.f32 1.0, %s179_s0  ;;  %v27_v0 = vld [vmem:[#allocation4] sm:$0x3]  ;;  %v43_v6 = vstv %s179_s0  ;;  %s145_s0 = smov [#allocation7]  }
   0xf   :  { %v28_v1 = vld [vmem:[#allocation4 + $0x2] sm:$0x3]  ;;  %v29_v2 = vld [vmem:[#allocation4 + $0x4] sm:$0x3]  ;;  %v33_v3 = vmul.f32 0.2989, %v27_v0  ;;  %v44_v14 = vmul.f32 %v43_v6, %v27_v0 }
  0x10   :  { %v35_v4 = vmul.f32 0.587, %v28_v1  ;;  %v39_v5 = vmul.f32 0.114, %v29_v2  ;;  %v30_v7 = vld [vmem:[#allocation4 + $0x6] sm:$0x3]  ;;  %v50_v15 = vstv %s26_s18  ;;  %v45_v17 = vmul.f32 %v43_v6, %v28_v1 }
  0x11   :  { %v31_v8 = vld [vmem:[#allocation4 + $0x8] sm:$0x3]  ;;  %v32_v9 = vld [vmem:[#allocation4 + $0xa] sm:$0x3]  ;;  %v34_v11 = vmul.f32 0.2989, %v30_v7  ;;  %v46_v18 = vmul.f32 %v43_v6, %v29_v2  ;;  %v47_v22 = vmul.f32 %v43_v6, %v30_v7 }
  0x12   :  { %v37_v10 = vadd.f32 %v35_v4, %v33_v3  ;;  %v36_v12 = vmul.f32 0.587, %v31_v8  ;;  %v40_v13 = vmul.f32 0.114, %v32_v9  ;;  %v48_v23 = vmul.f32 %v43_v6, %v31_v8  ;;  %s82_s1 = sshll.u32 %s145_s0, 4  ;;  %s83_s1 = int_to_ptr.vmem [resolvable:$true] %s82_s1 }
  0x13   :  { %v49_v24 = vmul.f32 %v43_v6, %v32_v9  ;;  %s118_s21 = scalar_lea.vmem %s83_s1, 192  ;;  %p123_p6 = scmp.lt.s32.totalorder %s83_s1, %s83_s1 }
  0x14   :  { %v41_v16 = vadd.f32 %v39_v5, %v37_v10  ;;  %v38_v19 = vadd.f32 %v36_v12, %v34_v11  ;;  %p119_p5 = scmp.ne.s32.totalorder %s83_s1, %s118_s21  ;;  %p124_p7 = scmp.lt.s32.totalorder %s118_s21, %s118_s21 }
  0x16   :  { %v51_v20 = vmul.f32 %v50_v15, %v41_v16  ;;  %v42_v21 = vadd.f32 %v40_v13, %v38_v19  ;;  %p125_p8 = por %p124_p7, %p123_p6 }
  0x18   :  { %v53_v25 = vadd.f32 %v51_v20, %v44_v14  ;;  %v54_v26 = vadd.f32 %v51_v20, %v45_v17  ;;  %v55_v27 = vadd.f32 %v51_v20, %v46_v18  ;;  %v52_v28 = vmul.f32 %v50_v15, %v42_v21  ;;  %p126_p9 = pnand %p125_p8, %p119_p5 }
  0x1a   :  { %v59_v29 = vmax.f32 %v53_v25, 0.0  ;;  %v60_v30 = vmax.f32 %v54_v26, 0.0  ;;  %v61_v31 = vmax.f32 %v55_v27, 0.0  ;;  %v56_v32 = vadd.f32 %v52_v28, %v47_v22 }
  0x1b   :  { %v57_v33 = vadd.f32 %v52_v28, %v48_v23  ;;  %v58_v34 = vadd.f32 %v52_v28, %v49_v24 }
  0x1c   :  { %v65_v35 = vmin.f32 %v59_v29, 1.0  ;;  %v66_v36 = vmin.f32 %v60_v30, 1.0  ;;  %v67_v37 = vmin.f32 %v61_v31, 1.0  ;;  %v62_v38 = vmax.f32 %v56_v32, 0.0 }
  0x1d   :  { %v63_v39 = vmax.f32 %v57_v33, 0.0  ;;  %v64_v40 = vmax.f32 %v58_v34, 0.0 }
  0x1e   :  { %71 = vst [vmem:[#allocation7] sm:$0x3] %v65_v35  ;;  %72 = vst [vmem:[#allocation7 + $0x2] sm:$0x3] %v66_v36  ;;  %v68_v41 = vmin.f32 %v62_v38, 1.0 }
  0x1f   :  { %73 = vst [vmem:[#allocation7 + $0x4] sm:$0x3] %v67_v37  ;;  %v69_v42 = vmin.f32 %v63_v39, 1.0  ;;  %v70_v43 = vmin.f32 %v64_v40, 1.0 }
  0x20   :  { %74 = vst [vmem:[#allocation7 + $0x6] sm:$0x3] %v68_v41 }
  0x21   :  { %75 = vst [vmem:[#allocation7 + $0x8] sm:$0x3] %v69_v42  ;;  %76 = vst [vmem:[#allocation7 + $0xa] sm:$0x3] %v70_v43 }
  0x22   :  { %129 = shalt.err (!%p126_p9)
}
  0x23   :  { %88 = dma.vmem_to_hbm [thread:$0]  %s83_s1, 192, %s181_s2, [#allocation6], %s143_s12, %s143_s12, %s144_s13  }
  0x24   :  { %140 = dma.done.wait [#allocation6], 192  }
  0x25   :  { %141 = vsyncadd [#allocation6], 4294967104 }
  0x26   :  { %92 = vsyncpa [#allocation5], 1 }
  0x27   :  { %93 = vsyncpa [#allocation6], 1 }

</bundles_post_ra>
